<compile_context>
chip_gen: v7x
topology: tpu7x:2x2x1
jax: 0.10.0
libtpu: 0.0.40
codegen_flags: <defaults>
</compile_context>

<pallas_src>
import functools
import math

import jax
import jax.numpy as jnp
from jax.experimental import pallas as pl
from jax.experimental.pallas import tpu as pltpu


# The torch module takes the gate activation as a constructor argument; it is
# exposed here as a static string.  "gelu_tanh" (default) lowers to the EUP;
# "gelu_erf" matches torch.nn.GELU() numerics; "sigmoid" is classic GLU.
_ACTIVATIONS = {
    "gelu_tanh": lambda g: jax.nn.gelu(g, approximate=True),
    "gelu_erf": lambda g: jax.nn.gelu(g, approximate=False),
    "sigmoid": jax.nn.sigmoid,
    "silu": jax.nn.silu,
    "relu": lambda g: jnp.maximum(g, 0.0),
    "identity": lambda g: g,
}


def _glu_kernel(x_ref, wv_ref, wg_ref, b_ref, o_ref, acc_h, acc_g, *, act_fn):
    k = pl.program_id(2)

    @pl.when(k == 0)
    def _init():
        acc_h[...] = jnp.zeros_like(acc_h)
        acc_g[...] = jnp.zeros_like(acc_g)

    x = x_ref[...]  # native dtype straight into the MXU (no up-cast)
    acc_h[...] += jnp.dot(x, wv_ref[...], preferred_element_type=jnp.float32)
    acc_g[...] += jnp.dot(x, wg_ref[...], preferred_element_type=jnp.float32)

    @pl.when(k == pl.num_programs(2) - 1)
    def _finalize():
        bias = b_ref[...].astype(jnp.float32)      # (2, bn): row0=value, row1=gate
        h = acc_h[...] + bias[0:1, :]
        g = acc_g[...] + bias[1:2, :]
        o_ref[...] = (h * act_fn(g)).astype(o_ref.dtype)


def _round_up(v, mult):
    return ((v + mult - 1) // mult) * mult


def _largest_aligned_divisor(dim, cap, align=128):
    """Largest multiple of `align` dividing `dim` (itself `align`-aligned), <= cap."""
    best = align
    d = align
    top = min(dim, max(cap, align))
    while d <= top:
        if dim % d == 0:
            best = d
        d += align
    return best


@functools.partial(
    jax.jit,
    static_argnames=("activation", "block_m", "block_n", "block_k", "cast_to_bf16"))
def glu_forward(x, w, b, *, activation="gelu_tanh",
                block_m=1024, block_n=1024, block_k=512,
                cast_to_bf16=False):
    """out = value * act(gate) where [value | gate] = x @ w + b.

    x: (..., dim_in); w: (dim_in, 2*dim_out); b: (2*dim_out,).
    """
    act_fn = _ACTIVATIONS[activation]

    *lead, dim_in = x.shape
    dim_out = w.shape[1] // 2
    m = math.prod(lead) if lead else 1
    out_dtype = x.dtype

    x2 = x.reshape(m, dim_in)
    if cast_to_bf16:
        if x2.dtype == jnp.float32:
            x2 = x2.astype(jnp.bfloat16)
        if w.dtype == jnp.float32:
            w = w.astype(jnp.bfloat16)
    b32 = b.astype(jnp.float32)

    # Shape-aware tile aspect ratio: the weight is re-streamed once per M tile
    # and the activations once per N tile, so give the axis whose *other*
    # operand is heavier the larger tile (bm*bn, hence accumulator VMEM, fixed).
    if 2 * dim_out >= 4 * m:                     # weight-heavy
        bm_cap, bn_cap = 2 * block_m, max(block_n // 2, 128)
    elif m >= 8 * dim_out:                       # activation-heavy
        bm_cap, bn_cap = max(block_m // 2, 128), 2 * block_n
    else:
        bm_cap, bn_cap = block_m, block_n

    # K (reduction) axis: bk must exactly divide the (padded) dim_in so no
    # out-of-bounds garbage is ever accumulated.
    if dim_in <= block_k:
        dim_in_p, bk = dim_in, dim_in
    else:
        dim_in_p = _round_up(dim_in, 128)
        bk = _largest_aligned_divisor(dim_in_p, block_k)
        if dim_in_p != dim_in:
            x2 = jnp.pad(x2, ((0, 0), (0, dim_in_p - dim_in)))
            w = jnp.pad(w, ((0, dim_in_p - dim_in), (0, 0)))

    # N axis: zero-copy half selection when 128-aligned, zero-padding otherwise
    # (never a full-extent unaligned block -> lane-dense stores, bounded VMEM).
    if dim_out % 128 == 0:
        dim_out_p = dim_out
        bn = _largest_aligned_divisor(dim_out_p, bn_cap)
        w_val = w_gate = w                       # same HBM array, two DMA streams
        gate_off = dim_out // bn                 # gate half via block offset
        bias2 = b32.reshape(2, dim_out)
    else:
        # TODO(synk): for large unaligned dim_out, pad the projection weight once
        # at parameter-init time instead of per call.
        dim_out_p = _round_up(dim_out, 128)
        pad_n = dim_out_p - dim_out
        bn = _largest_aligned_divisor(dim_out_p, bn_cap)
        w_val = jnp.pad(w[:, :dim_out], ((0, 0), (0, pad_n)))
        w_gate = jnp.pad(w[:, dim_out:], ((0, 0), (0, pad_n)))
        gate_off = 0
        bias2 = jnp.stack([jnp.pad(b32[:dim_out], (0, pad_n)),
                           jnp.pad(b32[dim_out:], (0, pad_n))])

    # M axis: ragged last block is fine (masked stores); sublane-align bm.
    if m <= bm_cap:
        bm = m
    else:
        bm = max((bm_cap // 8) * 8, 8)

    assert dim_in_p % bk == 0 and dim_out_p % bn == 0

    grid = (pl.cdiv(m, bm), dim_out_p // bn, dim_in_p // bk)

    x_item = x2.dtype.itemsize
    w_item = w_val.dtype.itemsize
    o_item = jnp.dtype(out_dtype).itemsize

    # Explicit scoped-VMEM limit derived from the actual footprint (review item).
    footprint = (2 * bm * bn * 4                # two f32 accumulators
                 + 2 * bm * bk * x_item         # x block, double-buffered
                 + 2 * 2 * bk * bn * w_item     # value + gate weight blocks
                 + 2 * 2 * bn * 4               # bias block
                 + 2 * bm * bn * o_item)        # output block
    vmem_limit = min(max(int(footprint * 1.25) + (2 << 20), 32 * 1024 * 1024),
                     110 * 1024 * 1024)

    cost = pl.CostEstimate(
        flops=4 * m * dim_in_p * dim_out_p,
        transcendentals=m * dim_out_p,
        bytes_accessed=(grid[1] * m * dim_in_p * x_item
                        + grid[0] * dim_in_p * 2 * dim_out_p * w_item
                        + m * dim_out_p * o_item))

    def _x_map(i, j, k):
        return (i, k)

    def _wv_map(i, j, k):
        return (k, j)

    def _wg_map(i, j, k):
        return (k, j + gate_off)

    def _b_map(i, j, k):
        return (0, j)

    def _o_map(i, j, k):
        return (i, j)

    out = pl.pallas_call(
        functools.partial(_glu_kernel, act_fn=act_fn),
        out_shape=jax.ShapeDtypeStruct((m, dim_out_p), out_dtype),
        grid_spec=pltpu.PrefetchScalarGridSpec(
            num_scalar_prefetch=0,
            grid=grid,
            in_specs=[
                pl.BlockSpec((bm, bk), _x_map),
                pl.BlockSpec((bk, bn), _wv_map),
                pl.BlockSpec((bk, bn), _wg_map),
                pl.BlockSpec((2, bn), _b_map),
            ],
            out_specs=pl.BlockSpec((bm, bn), _o_map),
            scratch_shapes=[
                pltpu.VMEM((bm, bn), jnp.float32),   # value-path accumulator
                pltpu.VMEM((bm, bn), jnp.float32),   # gate-path accumulator
            ],
        ),
        compiler_params=pltpu.CompilerParams(
            dimension_semantics=("parallel", "parallel", "arbitrary"),
            vmem_limit_bytes=vmem_limit),
        cost_estimate=cost,
    )(x2, w_val, w_gate, bias2)

    if dim_out_p != dim_out:
        out = out[:, :dim_out]
    return out.reshape(*lead, dim_out)


def init_glu_params(key, dim_in, dim_out, dtype=jnp.float32):
    """nn.Linear-style init: U(-1/sqrt(dim_in), 1/sqrt(dim_in))."""
    kw, kb = jax.random.split(key)
    bound = 1.0 / math.sqrt(dim_in)
    w = jax.random.uniform(kw, (dim_in, 2 * dim_out), dtype, -bound, bound)
    b = jax.random.uniform(kb, (2 * dim_out,), dtype, -bound, bound)
    return w, b


def _reference_glu(x, w, b, activation):
    act = _ACTIVATIONS[activation]
    proj = jnp.dot(x, w, precision=jax.lax.Precision.HIGHEST) + b
    dim_out = w.shape[1] // 2
    return proj[..., :dim_out] * act(proj[..., dim_out:])


def _max_abs_err(a, ref):
    return float(jnp.max(jnp.abs(a.astype(jnp.float32) - ref.astype(jnp.float32))))


if __name__ == "__main__":
    key = jax.random.PRNGKey(0)
    k1, k2, k3, k4 = jax.random.split(key, 4)
    batch, seq = 2, 8

    # 1) 128-aligned dims -> zero-copy gate-half selection via BlockSpec offset.
    dim_in, dim_out = 128, 128
    x = jax.random.normal(k1, (batch, seq, dim_in), jnp.float32)
    w, b = init_glu_params(k2, dim_in, dim_out)
    out = jax.block_until_ready(glu_forward(x, w, b))
    assert out.shape == (batch, seq, dim_out), out.shape
    err = _max_abs_err(out, _reference_glu(x, w, b, "gelu_tanh"))
    assert err < 2e-2, f"aligned f32 path: max abs err {err}"

    # 2) Small / unaligned dim_out -> zero-padded lane-dense path, sigmoid gate.
    dim_in_s, dim_out_s = 32, 32
    x_s = jax.random.normal(k3, (batch, seq, dim_in_s), jnp.float32)
    w_s, b_s = init_glu_params(k4, dim_in_s, dim_out_s)
    out_s = jax.block_until_ready(glu_forward(x_s, w_s, b_s, activation="sigmoid"))
    assert out_s.shape == (batch, seq, dim_out_s), out_s.shape
    err_s = _max_abs_err(out_s, _reference_glu(x_s, w_s, b_s, "sigmoid"))
    assert err_s < 2e-2, f"padded path: max abs err {err_s}"

    # 3) bf16 operand path (native-dtype MXU feed, f32 accumulation).
    out_b = jax.block_until_ready(glu_forward(x, w, b, cast_to_bf16=True))
    ref_b = _reference_glu(x.astype(jnp.bfloat16).astype(jnp.float32),
                           w.astype(jnp.bfloat16).astype(jnp.float32),
                           b.astype(jnp.float32), "gelu_tanh")
    err_b = _max_abs_err(out_b, ref_b)
    assert err_b < 5e-2, f"bf16 operand path: max abs err {err_b}"

    print("KERNEL_OK")
</pallas_src>

<mosaic_0001>
module attributes {stable_mosaic.version = 11 : i64} {
  func.func @_glu_kernel(%arg0: i32, %arg1: i32, %arg2: i32, %arg3: memref<16x128xf32, #tpu.memory_space<vmem>>, %arg4: memref<128x128xf32, #tpu.memory_space<vmem>>, %arg5: memref<128x128xf32, #tpu.memory_space<vmem>>, %arg6: memref<2x128xf32, #tpu.memory_space<vmem>>, %arg7: memref<16x128xf32, #tpu.memory_space<vmem>>, %arg8: memref<16x128xf32, #tpu.memory_space<vmem>>, %arg9: memref<16x128xf32, #tpu.memory_space<vmem>>) attributes {dimension_semantics = [#tpu.dimension_semantics<parallel>, #tpu.dimension_semantics<parallel>, #tpu.dimension_semantics<arbitrary>], iteration_bounds = array<i64: 1, 1, 1>, scalar_prefetch = 0 : i64, scratch_operands = 2 : i64, tpu.core_type = #tpu.core_type<tc>, window_params = [{transform_indices = @transform_0, window_bounds = array<i64: 16, 128>}, {transform_indices = @transform_1, window_bounds = array<i64: 128, 128>}, {transform_indices = @transform_2, window_bounds = array<i64: 128, 128>}, {transform_indices = @transform_3, window_bounds = array<i64: 2, 128>}, {transform_indices = @transform_4, window_bounds = array<i64: 16, 128>}]} {
    %c0_i32 = arith.constant 0 : i32
    %0 = arith.cmpi eq, %arg2, %c0_i32 : i32
    %1 = arith.extui %0 : i1 to i32
    %c0_i32_0 = arith.constant 0 : i32
    %2 = arith.cmpi ne, %1, %c0_i32_0 : i32
    scf.if %2 {
      %cst_17 = arith.constant 0.000000e+00 : f32
      %17 = vector.broadcast %cst_17 : f32 to vector<16x128xf32>
      %c0_18 = arith.constant 0 : index
      %c0_19 = arith.constant 0 : index
      %18 = vector.load %arg8[%c0_18, %c0_19] : memref<16x128xf32, #tpu.memory_space<vmem>>, vector<16x128xf32>
      tpu.vector_store %arg8[%c0_18, %c0_19], %17 {strides = array<i32>} : memref<16x128xf32, #tpu.memory_space<vmem>>, vector<16x128xf32>,
      %cst_20 = arith.constant 0.000000e+00 : f32
      %19 = vector.broadcast %cst_20 : f32 to vector<16x128xf32>
      %c0_21 = arith.constant 0 : index
      %c0_22 = arith.constant 0 : index
      %20 = vector.load %arg9[%c0_21, %c0_22] : memref<16x128xf32, #tpu.memory_space<vmem>>, vector<16x128xf32>
      tpu.vector_store %arg9[%c0_21, %c0_22], %19 {strides = array<i32>} : memref<16x128xf32, #tpu.memory_space<vmem>>, vector<16x128xf32>,
    } else {
    }
    %c0 = arith.constant 0 : index
    %c0_1 = arith.constant 0 : index
    %3 = vector.load %arg3[%c0, %c0_1] : memref<16x128xf32, #tpu.memory_space<vmem>>, vector<16x128xf32>
    %c0_2 = arith.constant 0 : index
    %c0_3 = arith.constant 0 : index
    %4 = vector.load %arg8[%c0_2, %c0_3] : memref<16x128xf32, #tpu.memory_space<vmem>>, vector<16x128xf32>
    %c0_4 = arith.constant 0 : index
    %c0_5 = arith.constant 0 : index
    %5 = vector.load %arg4[%c0_4, %c0_5] : memref<128x128xf32, #tpu.memory_space<vmem>>, vector<128x128xf32>
    %cst = arith.constant dense<0.000000e+00> : vector<16x128xf32>
    %6 = tpu.matmul %3, %5, %cst {dimension_numbers = #tpu.dot_dimension_numbers<[1], [0], [0], [1], [0, 0, 1, 1], [], []>} : vector<16x128xf32>, vector<128x128xf32>, vector<16x128xf32> -> vector<16x128xf32>
    %7 = arith.addf %4, %6 : vector<16x128xf32>
    %c0_6 = arith.constant 0 : index
    %c0_7 = arith.constant 0 : index
    %8 = vector.load %arg8[%c0_6, %c0_7] : memref<16x128xf32, #tpu.memory_space<vmem>>, vector<16x128xf32>
    tpu.vector_store %arg8[%c0_6, %c0_7], %7 {strides = array<i32>} : memref<16x128xf32, #tpu.memory_space<vmem>>, vector<16x128xf32>,
    %c0_8 = arith.constant 0 : index
    %c0_9 = arith.constant 0 : index
    %9 = vector.load %arg9[%c0_8, %c0_9] : memref<16x128xf32, #tpu.memory_space<vmem>>, vector<16x128xf32>
    %c0_10 = arith.constant 0 : index
    %c0_11 = arith.constant 0 : index
    %10 = vector.load %arg5[%c0_10, %c0_11] : memref<128x128xf32, #tpu.memory_space<vmem>>, vector<128x128xf32>
    %cst_12 = arith.constant dense<0.000000e+00> : vector<16x128xf32>
    %11 = tpu.matmul %3, %10, %cst_12 {dimension_numbers = #tpu.dot_dimension_numbers<[1], [0], [0], [1], [0, 0, 1, 1], [], []>} : vector<16x128xf32>, vector<128x128xf32>, vector<16x128xf32> -> vector<16x128xf32>
    %12 = arith.addf %9, %11 : vector<16x128xf32>
    %c0_13 = arith.constant 0 : index
    %c0_14 = arith.constant 0 : index
    %13 = vector.load %arg9[%c0_13, %c0_14] : memref<16x128xf32, #tpu.memory_space<vmem>>, vector<16x128xf32>
    tpu.vector_store %arg9[%c0_13, %c0_14], %12 {strides = array<i32>} : memref<16x128xf32, #tpu.memory_space<vmem>>, vector<16x128xf32>,
    %c0_i32_15 = arith.constant 0 : i32
    %14 = arith.cmpi eq, %arg2, %c0_i32_15 : i32
    %15 = arith.extui %14 : i1 to i32
    %c0_i32_16 = arith.constant 0 : i32
    %16 = arith.cmpi ne, %15, %c0_i32_16 : i32
    scf.if %16 {
      %c0_17 = arith.constant 0 : index
      %c0_18 = arith.constant 0 : index
      %17 = vector.load %arg6[%c0_17, %c0_18] : memref<2x128xf32, #tpu.memory_space<vmem>>, vector<2x128xf32>
      %c0_19 = arith.constant 0 : index
      %c0_20 = arith.constant 0 : index
      %18 = vector.load %arg8[%c0_19, %c0_20] : memref<16x128xf32, #tpu.memory_space<vmem>>, vector<16x128xf32>
      %19 = vector.extract_strided_slice %17 {offsets = [0, 0], sizes = [1, 128], strides = [1, 1]} : vector<2x128xf32> to vector<1x128xf32>
      %20 = vector.broadcast %19 : vector<1x128xf32> to vector<16x128xf32>
      %21 = arith.addf %18, %20 : vector<16x128xf32>
      %c0_21 = arith.constant 0 : index
      %c0_22 = arith.constant 0 : index
      %22 = vector.load %arg9[%c0_21, %c0_22] : memref<16x128xf32, #tpu.memory_space<vmem>>, vector<16x128xf32>
      %23 = vector.extract_strided_slice %17 {offsets = [1, 0], sizes = [1, 128], strides = [1, 1]} : vector<2x128xf32> to vector<1x128xf32>
      %24 = vector.broadcast %23 : vector<1x128xf32> to vector<16x128xf32>
      %25 = arith.addf %22, %24 : vector<16x128xf32>
      %26 = arith.mulf %25, %25 : vector<16x128xf32>
      %27 = arith.mulf %25, %26 : vector<16x128xf32>
      %cst_23 = arith.constant 4.471500e-02 : f32
      %28 = vector.broadcast %cst_23 : f32 to vector<16x128xf32>
      %29 = arith.mulf %28, %27 : vector<16x128xf32>
      %30 = arith.addf %25, %29 : vector<16x128xf32>
      %cst_24 = arith.constant 0.797884583 : f32
      %31 = vector.broadcast %cst_24 : f32 to vector<16x128xf32>
      %32 = arith.mulf %31, %30 : vector<16x128xf32>
      %33 = math.tanh %32 : vector<16x128xf32>
      %cst_25 = arith.constant 1.000000e+00 : f32
      %34 = vector.broadcast %cst_25 : f32 to vector<16x128xf32>
      %35 = arith.addf %34, %33 : vector<16x128xf32>
      %cst_26 = arith.constant 5.000000e-01 : f32
      %36 = vector.broadcast %cst_26 : f32 to vector<16x128xf32>
      %37 = arith.mulf %36, %35 : vector<16x128xf32>
      %38 = arith.mulf %25, %37 : vector<16x128xf32>
      %39 = arith.mulf %21, %38 : vector<16x128xf32>
      %c0_27 = arith.constant 0 : index
      %c0_28 = arith.constant 0 : index
      %40 = vector.load %arg7[%c0_27, %c0_28] : memref<16x128xf32, #tpu.memory_space<vmem>>, vector<16x128xf32>
      tpu.vector_store %arg7[%c0_27, %c0_28], %39 {strides = array<i32>} : memref<16x128xf32, #tpu.memory_space<vmem>>, vector<16x128xf32>,
    } else {
    }
    return
  }
  func.func @transform_0(%arg0: i32, %arg1: i32, %arg2: i32) -> (i32, i32) {
    %c0_i32 = arith.constant 0 : i32
    return %arg0, %arg2 : i32, i32
  }
  func.func @transform_1(%arg0: i32, %arg1: i32, %arg2: i32) -> (i32, i32) {
    %c0_i32 = arith.constant 0 : i32
    return %arg2, %arg1 : i32, i32
  }
  func.func @transform_2(%arg0: i32, %arg1: i32, %arg2: i32) -> (i32, i32) {
    %c1_i32 = arith.constant 1 : i32
    %0 = arith.addi %arg1, %c1_i32 : i32
    %c0_i32 = arith.constant 0 : i32
    return %arg2, %0 : i32, i32
  }
  func.func @transform_3(%arg0: i32, %arg1: i32, %arg2: i32) -> (i32, i32) {
    %c0_i32 = arith.constant 0 : i32
    %c0_i32_0 = arith.constant 0 : i32
    return %c0_i32, %arg1 : i32, i32
  }
  func.func @transform_4(%arg0: i32, %arg1: i32, %arg2: i32) -> (i32, i32) {
    %c0_i32 = arith.constant 0 : i32
    return %arg0, %arg1 : i32, i32
  }
}

</mosaic_0001>

<bundles_post_ra>
// kernel: glu_forward.1
= control target key start
LH: loop header
LB: loop body
LE: loop exit
PB: predicated region body
PF: predicated region fallthrough
CT: control target
= control target key end

     0   :  { %9 = vsyncpa [#allocation5], 0  ;;  %s704_s0 = inlined_call_operand.hbm [shape: f32[16,128], index: 0, kind: input, shape index: {}]   ;;  %s705_s1 = inlined_call_operand.hbm [shape: f32[128,256], index: 1, kind: input, shape index: {}, may-alias: {1,2}]   ;;  %s706_s2 = inlined_call_operand.hbm [shape: f32[128,256], index: 2, kind: input, shape index: {}, may-alias: {1,2}]   ;;  %s707_s3 = inlined_call_operand.vmem [shape: f32[2,128], index: 3, kind: input, shape index: {}]   ;;  %s708_s4 = inlined_call_operand.hbm [shape: f32[16,128], index: 4, kind: output, shape index: {}]  }
   0x1   :  { %10 = vsyncpa [#allocation8], 0 }
   0x2   :  { %11 = vsyncpa [#allocation6], 0  ;;  %s606_s15 = smov [#allocation7]   ;;  %s607_s17 = smov [#allocation4]  }
   0x3   :  { %s29_s16 = sshll.u32 %s606_s15, 4  ;;  %s17_s18 = sshll.u32 %s607_s17, 4  ;;  %s30_s16 = int_to_ptr.vmem [resolvable:$true] %s29_s16  ;;  %s18_s18 = int_to_ptr.vmem [resolvable:$true] %s17_s18 }
   0x4   :  { %s509_s21 = scalar_lea.hbm %s705_s1, 2048  ;;  %s511_s26 = scalar_lea.hbm %s705_s1, 4096 }
   0x5   :  { %p510_p0 = scmp.ne.s32.totalorder %s705_s1, %s509_s21  ;;  %p512_p1 = scmp.lt.u32.totalorder %s511_s26, %s509_s21 }
   0x6   :  { %p513_p2 = scmp.lt.u32.totalorder %s509_s21, %s705_s1 }
   0x8   :  { %p514_p3 = por %p513_p2, %p512_p1 }
   0xa   :  { %p515_p4 = pnand %p514_p3, %p510_p0 }
   0xc   :  { %518 = shalt.err (!%p515_p4)
}
   0xd   :  { %s519_s29 = scalar_lea.vmem %s30_s16, 2048  ;;  %p524_p6 = scmp.lt.s32.totalorder %s30_s16, %s30_s16 }
   0xe   :  { %p520_p5 = scmp.ne.s32.totalorder %s30_s16, %s519_s29  ;;  %p525_p7 = scmp.lt.s32.totalorder %s519_s29, %s519_s29 }
  0x10   :  { %p526_p8 = por %p525_p7, %p524_p6 }
  0x12   :  { %p527_p9 = pnand %p526_p8, %p520_p5 }
  0x14   :  { %530 = shalt.err (!%p527_p9)
}
  0x15   :  { %s608_s30 = smov 256   ;;  %s609_s5 = smov 128  }
  0x16   :  { %s610_s6 = smov 8   ;;  %s531_s11 = scalar_lea.hbm %s704_s0, 256 }
  0x17   :  { %35 = dma.hbm_to_vmem [thread:$0]  %s705_s1, 2048, %s30_s16, [#allocation8], %s608_s30, %s609_s5, %s610_s6  }
  0x18   :  { %p532_p10 = scmp.ne.s32.totalorder %s704_s0, %s531_s11  ;;  %p535_p11 = scmp.lt.u32.totalorder %s531_s11, %s704_s0 }
  0x1a   :  { %p537_p12 = pnand %p535_p11, %p532_p10 }
  0x1c   :  { %540 = shalt.err (!%p537_p12)
}
  0x1d   :  { %s541_s17 = scalar_lea.vmem %s18_s18, 256  ;;  %p546_p0 = scmp.lt.s32.totalorder %s18_s18, %s18_s18 }
  0x1e   :  { %p542_p13 = scmp.ne.s32.totalorder %s18_s18, %s541_s17  ;;  %p547_p1 = scmp.lt.s32.totalorder %s541_s17, %s541_s17 }
  0x20   :  { %p548_p2 = por %p547_p1, %p546_p0 }
  0x22   :  { %p549_p3 = pnand %p548_p2, %p542_p13 }
  0x24   :  { %552 = shalt.err (!%p549_p3)
}
  0x25   :  { %23 = dma.hbm_to_vmem [thread:$0]  %s704_s0, 256, %s18_s18, [#allocation5], %s609_s5, %s609_s5, %s610_s6  }
  0x26   :  { %s327_s21 = scalar_lea.hbm %s706_s2, 128  ;;  %s611_s22 = smov [#allocation9]  }
  0x27   :  { %s44_s23 = sshll.u32 %s611_s22, 4  ;;  %s577_s26 = scalar_lea.hbm %s706_s2, 2176  ;;  %s45_s23 = int_to_ptr.vmem [resolvable:$true] %s44_s23 }
  0x28   :  { %p554_p4 = scmp.ne.s32.totalorder %s327_s21, %s577_s26  ;;  %s555_s29 = scalar_lea.hbm %s706_s2, 4096 }
  0x29   :  { %p556_p5 = scmp.lt.u32.totalorder %s327_s21, %s706_s2  ;;  %p557_p6 = scmp.lt.u32.totalorder %s555_s29, %s577_s26 }
  0x2a   :  { %p559_p8 = scmp.lt.u32.totalorder %s577_s26, %s327_s21 }
  0x2b   :  { %p558_p7 = por %p557_p6, %p556_p5 }
  0x2d   :  { %p560_p9 = por %p559_p8, %p558_p7 }
  0x2f   :  { %p561_p10 = pnand %p560_p9, %p554_p4 }
  0x31   :  { %564 = shalt.err (!%p561_p10)
}
  0x32   :  { %s565_s0 = scalar_lea.vmem %s45_s23, 2048  ;;  %p570_p12 = scmp.lt.s32.totalorder %s45_s23, %s45_s23 }
  0x33   :  { %p566_p11 = scmp.ne.s32.totalorder %s45_s23, %s565_s0  ;;  %p571_p13 = scmp.lt.s32.totalorder %s565_s0, %s565_s0 }
  0x35   :  { %p572_p0 = por %p571_p13, %p570_p12 }
  0x37   :  { %p573_p1 = pnand %p572_p0, %p566_p11 }
  0x39   :  { %576 = shalt.err (!%p573_p1)
}
  0x3a   :  { %50 = dma.hbm_to_vmem [thread:$0]  %s327_s21, 2048, %s45_s23, [#allocation8], %s608_s30, %s609_s5, %s610_s6  }
  0x3b   :  { %600 = dma.done.wait [#allocation5], 256  }
  0x3c   :  { %601 = vsyncadd [#allocation5], 4294967040 }
  0x3d   :  { %602 = dma.done.wait [#allocation8], 4096  }
  0x3e   :  { %603 = vsyncadd [#allocation8], 4294963200  ;;  %v172_v0 = vld [vmem:[#allocation9] sm:$0xff]  ;;  %v173_v1 = vld [vmem:[#allocation9 + $0x8] sm:$0xff]  ;;  %v273_v50 = vlaneseq }
  0x3f   :  { %v174_v2 = vld [vmem:[#allocation9 + $0x10] sm:$0xff]  ;;  %v466_v3 = vpack.c.bf16 %v173_v1, %v172_v0  ;;  %v175_v4 = vld [vmem:[#allocation9 + $0x18] sm:$0xff]  ;;  %v176_v6 = vld [vmem:[#allocation9 + $0x20] sm:$0xff] }
  0x40   :  { %v470_v5 = vpack.c.bf16 %v175_v4, %v174_v2  ;;  %v177_v7 = vld [vmem:[#allocation9 + $0x28] sm:$0xff]  ;;  %v75_v8 = vld [vmem:[#allocation7] sm:$0xff]  ;;  %v178_v10 = vld [vmem:[#allocation9 + $0x30] sm:$0xff]  ;;  %v274_v51 = vshrl.u32 %v273_v50, 7 }
  0x41   :  { %467 = vmatprep.subr.bf16.mxu1 %v466_v3  ;;  %v474_v9 = vpack.c.bf16 %v177_v7, %v176_v6  ;;  %v179_v11 = vld [vmem:[#allocation9 + $0x38] sm:$0xff]  ;;  %v76_v12 = vld [vmem:[#allocation7 + $0x8] sm:$0xff]  ;;  %v77_v14 = vld [vmem:[#allocation7 + $0x10] sm:$0xff] }
  0x42   :  { %469 = vmatpush3.bf16.msra.mxu1 %v466_v3  ;;  %v434_v13 = vpack.c.bf16 %v76_v12, %v75_v8  ;;  %v78_v15 = vld [vmem:[#allocation7 + $0x18] sm:$0xff]  ;;  %v71_v16 = vld [vmem:[#allocation4] sm:$0xff]  ;;  %v79_v18 = vld [vmem:[#allocation7 + $0x20] sm:$0xff]  ;;  %v478_v20 = vpack.c.bf16 %v179_v11, %v178_v10  ;;  %v283_v52 = vsub.s32 1, %v274_v51  ;;  %v275_v7 = vsub.s32 0, %v274_v51 }
  0x43   :  { %471 = vmatprep.subr.bf16.mxu1 %v470_v5  ;;  %v438_v17 = vpack.c.bf16 %v78_v15, %v77_v14  ;;  %431 = vmatprep.mubr.f32.mxu1 %v71_v16  ;;  %v80_v19 = vld [vmem:[#allocation7 + $0x28] sm:$0xff]  ;;  %v180_v21 = vld [vmem:[#allocation9 + $0x40] sm:$0xff]  ;;  %v81_v24 = vld [vmem:[#allocation7 + $0x30] sm:$0xff] }
  0x44   :  { %396 = vmatprep.mubr.f32.mxu0 %v71_v16  ;;  %435 = vmatprep.subr.bf16.mxu0 %v434_v13  ;;  %v181_v22 = vld [vmem:[#allocation9 + $0x48] sm:$0xff]  ;;  %v442_v23 = vpack.c.bf16 %v80_v19, %v79_v18  ;;  %v82_v25 = vld [vmem:[#allocation7 + $0x38] sm:$0xff]  ;;  %v182_v27 = vld [vmem:[#allocation9 + $0x50] sm:$0xff] }
  0x45   :  { %437 = vmatpush3.bf16.msra.mxu0 %v434_v13  ;;  %v482_v26 = vpack.c.bf16 %v181_v22, %v180_v21  ;;  %v183_v28 = vld [vmem:[#allocation9 + $0x58] sm:$0xff]  ;;  %v446_v29 = vpack.c.bf16 %v82_v25, %v81_v24  ;;  %v83_v30 = vld [vmem:[#allocation7 + $0x40] sm:$0xff]  ;;  %v84_v31 = vld [vmem:[#allocation7 + $0x48] sm:$0xff] }
  0x46   :  { %473 = vmatpush3.bf16.msra.mxu1 %v470_v5  ;;  %439 = vmatprep.subr.bf16.mxu0 %v438_v17  ;;  %v486_v32 = vpack.c.bf16 %v183_v28, %v182_v27  ;;  %v184_v33 = vld [vmem:[#allocation9 + $0x60] sm:$0xff]  ;;  %v185_v34 = vld [vmem:[#allocation9 + $0x68] sm:$0xff]  ;;  %v450_v35 = vpack.c.bf16 %v84_v31, %v83_v30  ;;  %v85_v36 = vld [vmem:[#allocation7 + $0x50] sm:$0xff] }
  0x47   :  { %475 = vmatprep.subr.bf16.mxu1 %v474_v9  ;;  %v86_v37 = vld [vmem:[#allocation7 + $0x58] sm:$0xff]  ;;  %v490_v38 = vpack.c.bf16 %v185_v34, %v184_v33  ;;  %v186_v39 = vld [vmem:[#allocation9 + $0x70] sm:$0xff]  ;;  %v87_v42 = vld [vmem:[#allocation7 + $0x60] sm:$0xff] }
  0x48   :  { %v187_v40 = vld [vmem:[#allocation9 + $0x78] sm:$0xff]  ;;  %v454_v41 = vpack.c.bf16 %v86_v37, %v85_v36  ;;  %v88_v43 = vld [vmem:[#allocation7 + $0x68] sm:$0xff]  ;;  %v89_v46 = vld [vmem:[#allocation7 + $0x70] sm:$0xff] }
  0x49   :  { %441 = vmatpush3.bf16.msra.mxu0 %v438_v17  ;;  %v494_v44 = vpack.c.bf16 %v187_v40, %v186_v39  ;;  %v458_v45 = vpack.c.bf16 %v88_v43, %v87_v42  ;;  %v90_v47 = vld [vmem:[#allocation7 + $0x78] sm:$0xff]  ;;  %v270_v53 = vld [vmem:[%s707_s3] sm:$0x3]  ;;  %s612_s3 = smov [#allocation10]  }
  0x4a   :  { %477 = vmatpush3.bf16.msra.mxu1 %v474_v9  ;;  %443 = vmatprep.subr.bf16.mxu0 %v442_v23  ;;  %v462_v48 = vpack.c.bf16 %v90_v47, %v89_v46  ;;  %v72_v49 = vld [vmem:[#allocation4 + $0x8] sm:$0xff]  ;;  %v284_v54 = vrot.slane %v270_v53, %v283_v52  ;;  %v276_v8 = vrot.slane %v270_v53, %v275_v7  ;;  %s314_s30 = sshll.u32 %s612_s3, 4  ;;  %s315_s30 = int_to_ptr.vmem [resolvable:$true] %s314_s30 }
  0x4b   :  { %479 = vmatprep.subr.bf16.mxu1 %v478_v20  ;;  %s578_s9 = scalar_lea.vmem %s315_s30, 256  ;;  %p583_p3 = scmp.lt.s32.totalorder %s315_s30, %s315_s30 }
  0x4c   :  { %p579_p2 = scmp.ne.s32.totalorder %s315_s30, %s578_s9  ;;  %p584_p4 = scmp.lt.s32.totalorder %s578_s9, %s578_s9 }
  0x4d   :  { %445 = vmatpush3.bf16.msra.mxu0 %v442_v23 }
  0x4e   :  { %481 = vmatpush3.bf16.msra.mxu1 %v478_v20  ;;  %447 = vmatprep.subr.bf16.mxu0 %v446_v29  ;;  %p585_p5 = por %p584_p4, %p583_p3 }
  0x4f   :  { %483 = vmatprep.subr.bf16.mxu1 %v482_v26 }
  0x50   :  { %p586_p6 = pnand %p585_p5, %p579_p2 }
  0x51   :  { %449 = vmatpush3.bf16.msra.mxu0 %v446_v29 }
  0x52   :  { %485 = vmatpush3.bf16.msra.mxu1 %v482_v26  ;;  %451 = vmatprep.subr.bf16.mxu0 %v450_v35 }
  0x53   :  { %487 = vmatprep.subr.bf16.mxu1 %v486_v32 }
  0x55   :  { %453 = vmatpush3.bf16.msra.mxu0 %v450_v35 }
  0x56   :  { %489 = vmatpush3.bf16.msra.mxu1 %v486_v32  ;;  %455 = vmatprep.subr.bf16.mxu0 %v454_v41 }
  0x57   :  { %491 = vmatprep.subr.bf16.mxu1 %v490_v38 }
  0x59   :  { %457 = vmatpush3.bf16.msra.mxu0 %v454_v41 }
  0x5a   :  { %493 = vmatpush3.bf16.msra.mxu1 %v490_v38  ;;  %459 = vmatprep.subr.bf16.mxu0 %v458_v45 }
  0x5b   :  { %495 = vmatprep.subr.bf16.mxu1 %v494_v44 }
  0x5d   :  { %461 = vmatpush3.bf16.msra.mxu0 %v458_v45 }
  0x5e   :  { %497 = vmatpush3.bf16.msra.mxu1 %v494_v44  ;;  %463 = vmatprep.subr.bf16.mxu0 %v462_v48 }
  0x61   :  { %432 = vmatmul.mubr.f32.vlgmr.msra.gmra.mrb[0].mxu1 %v72_v49  ;;  %465 = vmatpush3.bf16.msra.mxu0 %v462_v48 }
  0x64   :  { %397 = vmatmul.mubr.f32.vlgmr.msra.gmra.mrb[0].mxu0 %v72_v49 }
 0x134   :  { %v433_v55 = vpop.f32.mrb[0].mxu1 }
 0x135   :  { %v286_v56 = vadd.f32 %v433_v55, %v284_v54  ;;  %v254_v57 = vpop.f32.mrb[1].mxu1 }
 0x136   :  { %v285_v58 = vadd.f32 %v284_v54, %v254_v57 }
 0x137   :  { %v288_v59 = vmul.f32 %v286_v56, %v286_v56  ;;  %v398_v62 = vpop.f32.mrb[0].mxu0 }
 0x138   :  { %v287_v60 = vmul.f32 %v285_v58, %v285_v58  ;;  %v157_v0 = vpop.f32.mrb[1].mxu0  ;;  %v278_v13 = vadd.f32 %v398_v62, %v276_v8 }
 0x139   :  { %v290_v61 = vmul.f32 %v288_v59, %v286_v56  ;;  %v277_v15 = vadd.f32 %v276_v8, %v157_v0 }
 0x13a   :  { %v289_v63 = vmul.f32 %v287_v60, %v285_v58 }
 0x13b   :  { %v292_v1 = vmul.f32 0.044715, %v290_v61 }
 0x13c   :  { %v291_v2 = vmul.f32 0.044715, %v289_v63 }
 0x13d   :  { %v294_v3 = vadd.f32 %v292_v1, %v286_v56 }
 0x13e   :  { %v293_v4 = vadd.f32 %v291_v2, %v285_v58 }
 0x13f   :  { %v296_v5 = vmul.f32 0.7978846, %v294_v3 }
 0x140   :  { %v295_v6 = vmul.f32 0.7978846, %v293_v4 }
 0x141   :  { %505 = vtanh.f32 %v296_v5 }
 0x142   :  { %507 = vtanh.f32 %v295_v6 }
 0x14b   :  { %v506_v9 = vpop.eup %505 }
 0x14c   :  { %v508_v10 = vpop.eup %507  ;;  %v300_v11 = vadd.f32 1.0, %v506_v9 }
 0x14d   :  { %v299_v12 = vadd.f32 1.0, %v508_v10 }
 0x14e   :  { %v302_v14 = vmul.f32 0.5, %v300_v11 }
 0x14f   :  { %v301_v16 = vmul.f32 0.5, %v299_v12 }
 0x150   :  { %v304_v17 = vmul.f32 %v302_v14, %v286_v56 }
 0x151   :  { %v303_v18 = vmul.f32 %v301_v16, %v285_v58 }
 0x152   :  { %v306_v19 = vmul.f32 %v304_v17, %v278_v13 }
 0x153   :  { %v305_v20 = vmul.f32 %v303_v18, %v277_v15 }
 0x154   :  { %308 = vst [vmem:[#allocation10 + $0x8] sm:$0xff] %v306_v19 }
 0x155   :  { %307 = vst [vmem:[#allocation10] sm:$0xff] %v305_v20 }
 0x156   :  { %589 = shalt.err (!%p586_p6)
}
 0x157   :  { %s590_s12 = scalar_lea.hbm %s708_s4, 256 }
 0x158   :  { %p591_p7 = scmp.ne.s32.totalorder %s708_s4, %s590_s12  ;;  %p594_p8 = scmp.lt.u32.totalorder %s590_s12, %s708_s4 }
 0x15a   :  { %p596_p9 = pnand %p594_p8, %p591_p7 }
 0x15c   :  { %599 = shalt.err (!%p596_p9)
}
 0x15d   :  { %320 = dma.vmem_to_hbm [thread:$0]  %s315_s30, 256, %s708_s4, [#allocation6], %s609_s5, %s609_s5, %s610_s6  }
 0x15e   :  { %604 = dma.done.wait [#allocation6], 256  }
 0x15f   :  { %605 = vsyncadd [#allocation6], 4294967040 }
 0x160   :  { %324 = vsyncpa [#allocation5], 1 }
 0x161   :  { %325 = vsyncpa [#allocation8], 1 }
 0x162   :  { %326 = vsyncpa [#allocation6], 1 }

</bundles_post_ra>
